<compile_context>
chip_gen: v7x
topology: tpu7x:2x2x1
jax: 0.10.0
libtpu: 0.0.40
codegen_flags: <defaults>
</compile_context>

<pallas_src>
import functools
import numpy as np

import jax
import jax.numpy as jnp
from jax.experimental import pallas as pl
from jax.experimental.pallas import tpu as pltpu


# ----------------------------- configuration --------------------------------
C = 256          # decoder channels (same as real module: c_in = c_out = 256)
CLASSES = 4      # number of segmentation classes
NODES = 3        # NAO cell nodes
BN_EPS = 1e-5
BN_FOLD = float(1.0 / np.sqrt(1.0 + BN_EPS))   # eval-mode BN affine folded into weights
NEG = -1.0e30                                  # max-pool padding value (bf16-safe)
# arch = [x_id, x_op, y_id, y_op] * NODES
ARCH = [0, 1, 1, 2,
        0, 0, 1, 3,
        0, 1, 1, 0]


def _pick_tile(d, cap):
    for t in (512, 256, 128, 64, 32, 16, 8):
        if t <= cap and t <= d and d % t == 0:
            return t
    return d


# ------------------------- tiled matmul (MXU path) ---------------------------
def _matmul_kernel(x_ref, w_ref, b_ref, o_ref, acc_ref, *, relu_in, relu_out):
    @pl.when(pl.program_id(2) == 0)
    def _():
        acc_ref[...] = jnp.zeros_like(acc_ref)

    x = x_ref[...]
    if relu_in:
        x = jnp.maximum(x, 0)
    acc_ref[...] += jnp.dot(x.astype(jnp.bfloat16), w_ref[...],
                            preferred_element_type=jnp.float32)

    @pl.when(pl.program_id(2) == pl.num_programs(2) - 1)
    def _():
        y = acc_ref[...] + b_ref[...]
        if relu_out:
            y = jnp.maximum(y, 0.0)
        o_ref[...] = y.astype(o_ref.dtype)


def matmul_bias_act(x, w, bias, relu_in=False, relu_out=False,
                    out_dtype=jnp.bfloat16):
    """(M,K)@(K,N) on the MXU with fused bias (+ReLU) epilogue.

    bf16 inputs, f32 VMEM accumulator, tiled grid so it scales to real sizes and
    shards across v7x's two TensorCores.
    """
    M, K = x.shape
    K2, N = w.shape
    assert K == K2
    tm = _pick_tile(M, 64)
    tn = _pick_tile(N, 256)
    tk = _pick_tile(K, 256)
    kernel = functools.partial(_matmul_kernel, relu_in=relu_in, relu_out=relu_out)
    return pl.pallas_call(
        kernel,
        out_shape=jax.ShapeDtypeStruct((M, N), out_dtype),
        grid=(M // tm, N // tn, K // tk),
        in_specs=[pl.BlockSpec((tm, tk), lambda i, j, k: (i, k)),
                  pl.BlockSpec((tk, tn), lambda i, j, k: (k, j)),
                  pl.BlockSpec((1, tn), lambda i, j, k: (0, j))],
        out_specs=pl.BlockSpec((tm, tn), lambda i, j, k: (i, j)),
        scratch_shapes=[pltpu.VMEM((tm, tn), jnp.float32)],
        compiler_params=pltpu.CompilerParams(
            dimension_semantics=("parallel", "parallel", "arbitrary")),
    )(x.astype(jnp.bfloat16), w, bias)


# ---------------------- fused 3x3 conv + BN (+ReLU) --------------------------
def _conv3x3_kernel(xp_ref, w_ref, b_ref, o_ref, xr_ref, *, H, W, relu_in, relu_out):
    # xp_ref: (1, H+2, W+2, Cin) bf16 padded input;  w_ref: (9, Cin, Cout) bf16
    # b_ref: (1, Cout) f32;  o_ref: (1, H, W, Cout);  xr_ref: VMEM bf16 scratch
    x0 = xp_ref[0]
    if relu_in:
        x0 = jnp.maximum(x0, 0)          # ReLU once (zero padding is ReLU-invariant)
    xr_ref[...] = x0
    cout = o_ref.shape[-1]
    acc = jnp.zeros((H * W, cout), jnp.float32)
    for k in range(9):                   # in-kernel 9-tap gather (no im2col in HBM)
        ky, kx = k // 3, k % 3
        win = xr_ref[ky:ky + H, kx:kx + W, :].reshape(H * W, -1)
        acc = acc + jnp.dot(win, w_ref[k], preferred_element_type=jnp.float32)
    y = acc + b_ref[...]
    if relu_out:
        y = jnp.maximum(y, 0.0)
    o_ref[0] = y.reshape(H, W, cout).astype(o_ref.dtype)


def conv3x3_bn(x, w, bias, relu_in=False, relu_out=False):
    """3x3 stride-1 pad-1 conv + folded BN affine (+ optional ReLUs), NHWC bf16."""
    B, H, W, Cin = x.shape
    Cout = w.shape[-1]
    xp = jnp.pad(x, ((0, 0), (1, 1), (1, 1), (0, 0)))
    kernel = functools.partial(_conv3x3_kernel, H=H, W=W,
                               relu_in=relu_in, relu_out=relu_out)
    return pl.pallas_call(
        kernel,
        out_shape=jax.ShapeDtypeStruct((B, H, W, Cout), jnp.bfloat16),
        grid=(B,),
        in_specs=[pl.BlockSpec((1, H + 2, W + 2, Cin), lambda b: (b, 0, 0, 0)),
                  pl.BlockSpec((9, Cin, Cout), lambda b: (0, 0, 0)),
                  pl.BlockSpec((1, Cout), lambda b: (0, 0))],
        out_specs=pl.BlockSpec((1, H, W, Cout), lambda b: (b, 0, 0, 0)),
        scratch_shapes=[pltpu.VMEM((H + 2, W + 2, Cin), jnp.bfloat16)],
        compiler_params=pltpu.CompilerParams(dimension_semantics=("parallel",)),
    )(xp, w, bias)


# ------- fused weight-shared sep-conv (ReLU->dw3x3->pw1x1->BN [+ add]) -------
def _sepconv_kernel(*refs, H, W, has_res):
    if has_res:
        xp_ref, dw_ref, pw_ref, res_ref, o_ref, xr_ref = refs
    else:
        xp_ref, dw_ref, pw_ref, o_ref, xr_ref = refs
        res_ref = None
    # ReLU once on the padded input (f32 scratch: portable to v5e's f32-only VPU).
    xr_ref[...] = jnp.maximum(xp_ref[0].astype(jnp.float32), 0.0)
    c = o_ref.shape[-1]
    acc = jnp.zeros((H * W, c), jnp.float32)
    for k in range(9):                   # in-kernel depthwise 3x3
        ky, kx = k // 3, k % 3
        win = xr_ref[ky:ky + H, kx:kx + W, :].reshape(H * W, c)
        acc = acc + win * dw_ref[k]      # dw_ref[k]: (1, C)
    y = jnp.dot(acc.astype(jnp.bfloat16), pw_ref[...],     # pointwise 1x1 (+ folded BN)
                preferred_element_type=jnp.float32)
    if has_res:                          # fused node add: x_op(x) + y_op(y)
        y = y + res_ref[0].reshape(H * W, c).astype(jnp.float32)
    o_ref[0] = y.reshape(H, W, c).astype(o_ref.dtype)


def ws_sepconv3x3(x, dw, pw, residual=None):
    B, H, W, Cc = x.shape
    xp = jnp.pad(x, ((0, 0), (1, 1), (1, 1), (0, 0)))
    has_res = residual is not None
    kernel = functools.partial(_sepconv_kernel, H=H, W=W, has_res=has_res)
    in_specs = [pl.BlockSpec((1, H + 2, W + 2, Cc), lambda b: (b, 0, 0, 0)),
                pl.BlockSpec((9, 1, Cc), lambda b: (0, 0, 0)),
                pl.BlockSpec((Cc, Cc), lambda b: (0, 0))]
    args = [xp, dw, pw]
    if has_res:
        in_specs.append(pl.BlockSpec((1, H, W, Cc), lambda b: (b, 0, 0, 0)))
        args.append(residual)
    return pl.pallas_call(
        kernel,
        out_shape=jax.ShapeDtypeStruct((B, H, W, Cc), jnp.bfloat16),
        grid=(B,),
        in_specs=in_specs,
        out_specs=pl.BlockSpec((1, H, W, Cc), lambda b: (b, 0, 0, 0)),
        scratch_shapes=[pltpu.VMEM((H + 2, W + 2, Cc), jnp.float32)],
        compiler_params=pltpu.CompilerParams(dimension_semantics=("parallel",)),
    )(*args)


# --------------------- fused avg/max pool 3x3 (+ add) ------------------------
def _pool3x3_kernel(*refs, H, W, mode, has_res):
    if has_res:
        xp_ref, res_ref, o_ref = refs
    else:
        xp_ref, o_ref = refs
        res_ref = None
    acc = None
    for k in range(9):                   # in-kernel 9-tap gather, read per tap
        ky, kx = k // 3, k % 3
        win = xp_ref[0, ky:ky + H, kx:kx + W, :].astype(jnp.float32)
        if acc is None:
            acc = win
        elif mode == 'max':
            acc = jnp.maximum(acc, win)
        else:
            acc = acc + win
    if mode == 'avg':
        acc = acc * (1.0 / 9.0)          # count_include_pad=True, like PyTorch
    if has_res:
        acc = acc + res_ref[0].astype(jnp.float32)
    o_ref[0] = acc.astype(o_ref.dtype)


def pool3x3(x, mode, residual=None):
    B, H, W, Cc = x.shape
    pad_val = 0.0 if mode == 'avg' else NEG
    xp = jnp.pad(x, ((0, 0), (1, 1), (1, 1), (0, 0)), constant_values=pad_val)
    has_res = residual is not None
    kernel = functools.partial(_pool3x3_kernel, H=H, W=W, mode=mode, has_res=has_res)
    in_specs = [pl.BlockSpec((1, H + 2, W + 2, Cc), lambda b: (b, 0, 0, 0))]
    args = [xp]
    if has_res:
        in_specs.append(pl.BlockSpec((1, H, W, Cc), lambda b: (b, 0, 0, 0)))
        args.append(residual)
    return pl.pallas_call(
        kernel,
        out_shape=jax.ShapeDtypeStruct((B, H, W, Cc), jnp.bfloat16),
        grid=(B,),
        in_specs=in_specs,
        out_specs=pl.BlockSpec((1, H, W, Cc), lambda b: (b, 0, 0, 0)),
        compiler_params=pltpu.CompilerParams(dimension_semantics=("parallel",)),
    )(*args)


# --------------------- lane-dense add (identity + identity) ------------------
def _add_kernel(a_ref, b_ref, o_ref):
    o_ref[...] = a_ref[...] + b_ref[...]


def pallas_add(a, b):
    B, H, W, Cc = a.shape
    M, N = B * H, W * Cc                 # minor axis W*C: lane-dense, unmasked stores
    a2 = a.reshape(M, N)
    b2 = b.reshape(M, N)
    tm = _pick_tile(M, 8)
    out = pl.pallas_call(
        _add_kernel,
        out_shape=jax.ShapeDtypeStruct((M, N), a.dtype),
        grid=(M // tm,),
        in_specs=[pl.BlockSpec((tm, N), lambda i: (i, 0)),
                  pl.BlockSpec((tm, N), lambda i: (i, 0))],
        out_specs=pl.BlockSpec((tm, N), lambda i: (i, 0)),
        compiler_params=pltpu.CompilerParams(dimension_semantics=("parallel",)),
    )(a2, b2)
    return out.reshape(B, H, W, Cc)


# -------- fused score conv + bilinear upsample (align_corners=False) ---------
def _bilinear_matrix(out_n, in_n):
    """PyTorch F.interpolate(mode='bilinear', align_corners=False) weights."""
    A = np.zeros((out_n, in_n), np.float32)
    scale = in_n / out_n
    for i in range(out_n):
        src = (i + 0.5) * scale - 0.5
        if src < 0.0:
            src = 0.0
        i0 = int(np.floor(src))
        frac = src - i0
        i0 = min(i0, in_n - 1)
        i1 = min(i0 + 1, in_n - 1)
        A[i, i0] += 1.0 - frac
        A[i, i1] += frac
    return A


def _score_upsample_kernel(dec_ref, ws_ref, bs_ref, t_ref, awp_ref, ahp_ref, o_ref):
    # 1x1 score conv (bf16 MXU, f32 acc).
    logits = jnp.dot(dec_ref[0], ws_ref[...], preferred_element_type=jnp.float32)
    logits = logits + bs_ref[...]                                      # (H*W, CL)
    # Tile classes along the Wo axis so the minor axis is Wo*CLASSES (lane dense).
    lane = jnp.dot(logits, t_ref[...], preferred_element_type=jnp.float32)
    r = lane * awp_ref[...]                                            # fold W-interp weights
    o_ref[0] = jnp.dot(ahp_ref[...], r, preferred_element_type=jnp.float32)  # H-interp


def score_and_upsample(dec, w_score, b_score, out_hw):
    """Fused score 1x1 conv + separable bilinear upsample; returns NCHW f32."""
    B, H, W, Cc = dec.shape
    Ho, Wo = out_hw
    Ah = _bilinear_matrix(Ho, H)                                  # (Ho, H)
    Aw = _bilinear_matrix(Wo, W)                                  # (Wo, W)
    ahp = jnp.asarray(np.repeat(Ah, W, axis=1))                   # (Ho, H*W)
    awp = jnp.asarray(np.tile(np.repeat(Aw.T, CLASSES, axis=1), (H, 1)))  # (H*W, Wo*CL)
    t = jnp.asarray(np.tile(np.eye(CLASSES, dtype=np.float32), (1, Wo)))  # (CL, Wo*CL)
    dec2 = dec.reshape(B, H * W, Cc)
    out = pl.pallas_call(
        _score_upsample_kernel,
        out_shape=jax.ShapeDtypeStruct((B, Ho, Wo * CLASSES), jnp.float32),
        grid=(B,),
        in_specs=[pl.BlockSpec((1, H * W, Cc), lambda b: (b, 0, 0)),
                  pl.BlockSpec((Cc, CLASSES), lambda b: (0, 0)),
                  pl.BlockSpec((1, CLASSES), lambda b: (0, 0)),
                  pl.BlockSpec((CLASSES, Wo * CLASSES), lambda b: (0, 0)),
                  pl.BlockSpec((H * W, Wo * CLASSES), lambda b: (0, 0)),
                  pl.BlockSpec((Ho, H * W), lambda b: (0, 0))],
        out_specs=pl.BlockSpec((1, Ho, Wo * CLASSES), lambda b: (b, 0, 0)),
        compiler_params=pltpu.CompilerParams(dimension_semantics=("parallel",)),
    )(dec2, w_score, b_score, t, awp, ahp)
    return out.reshape(B, Ho, Wo, CLASSES).transpose(0, 3, 1, 2)   # NCHW like PyTorch


# ----------------------------- NAO ops / cell --------------------------------
def apply_op(op_idx, x, x_id, branch, residual):
    if op_idx == 1:
        return ws_sepconv3x3(x, branch['dw'][x_id], branch['pw'][x_id], residual)
    if op_idx == 2:
        return pool3x3(x, 'avg', residual)
    if op_idx == 3:
        return pool3x3(x, 'max', residual)
    raise ValueError(f"unexpected op {op_idx}")


def node_forward(states, x_id, x_op, y_id, y_op, node_p):
    """x_op(x) + y_op(y); the add is fused into the second branch's kernel."""
    x_in, y_in = states[x_id], states[y_id]
    if x_op == 0 and y_op == 0:
        return pallas_add(x_in, y_in)
    if x_op == 0:
        return apply_op(y_op, y_in, y_id, node_p['y'], residual=x_in)
    if y_op == 0:
        return apply_op(x_op, x_in, x_id, node_p['x'], residual=y_in)
    xo = apply_op(x_op, x_in, x_id, node_p['x'], residual=None)
    return apply_op(y_op, y_in, y_id, node_p['y'], residual=xo)


def cell_forward(s0, s1, arch, params):
    states = [s0, s1]
    used = [0] * (NODES + 2)
    for i in range(NODES):
        x_id, x_op, y_id, y_op = arch[4 * i:4 * i + 4]
        used[x_id] += 1
        used[y_id] += 1
        states.append(node_forward(states, x_id, x_op, y_id, y_op,
                                   params['nodes'][i]))
    concat = [i for i, u in enumerate(used) if u == 0]
    cat = jnp.concatenate([states[i] for i in concat], axis=-1)       # (B,H,W,len*C)
    # WSReLUConvBN: concat the weight-shared 1x1 kernels of the selected inputs;
    # ReLU + conv + folded-BN done by the tiled matmul kernel (K-blocked).
    w = jnp.concatenate([params['w_comb'][i] for i in concat], axis=0)  # (len*C, C)
    B, H, W, K = cat.shape
    out = matmul_bias_act(cat.reshape(B * H * W, K), w, params['bias_full'],
                          relu_in=True)
    return out.reshape(B, H, W, C)


def decoder_forward(feat, arch, params):
    # stem0: conv3x3 -> BN -> ReLU -> conv3x3 -> BN   (BN folded into weights)
    h = conv3x3_bn(feat, params['w0a'], params['bias_half'], relu_out=True)
    s0 = conv3x3_bn(h, params['w0b'], params['bias_full'])
    # stem1: ReLU -> conv3x3 -> BN
    s1 = conv3x3_bn(s0, params['w1'], params['bias_full'], relu_in=True)
    return cell_forward(s0, s1, arch, params)


def backbone_stub(x_nchw, params):
    # TODO(synk): external deeplabv3plus_resnet50 backbone replaced by this
    # deterministic stride-8 avg-pool + 1x1 projection stub (output_stride=8).
    x = jnp.transpose(x_nchw, (0, 2, 3, 1))                 # NHWC
    B, H, W, Cin = x.shape
    x = x.reshape(B, H // 8, 8, W // 8, 8, Cin).mean(axis=(2, 4))
    _, h, w, _ = x.shape
    y = matmul_bias_act(x.reshape(B * h * w, Cin), params['w_backbone'],
                        params['bias_full'], relu_out=True)
    return y.reshape(B, h, w, C)


def nao_deeplabv3plus_search_forward(x_nchw, size, arch, params):
    """Mirrors NAO_deeplabv3plus_search.forward(x, size, arch) (eval mode)."""
    del size  # reference forward uses x.size()[2:4]
    feat = backbone_stub(x_nchw, params)                    # (B, h, w, C) NHWC bf16
    dec = decoder_forward(feat, arch[0], params)            # (B, h, w, C) bf16
    return score_and_upsample(dec, params['w_score'], params['b_score'],
                              x_nchw.shape[2:4])            # (B, CLASSES, H, W) f32


# ----------------------------- parameter init --------------------------------
def _kaiming(key, shape, fan_in):
    return jax.random.normal(key, shape, jnp.float32) * np.sqrt(2.0 / fan_in)


def init_params(key):
    ks = iter(jax.random.split(key, 64))
    p = {}
    p['bias_full'] = jnp.zeros((1, C), jnp.float32)
    p['bias_half'] = jnp.zeros((1, C // 2), jnp.float32)
    p['w_backbone'] = _kaiming(next(ks), (3, C), 3).astype(jnp.bfloat16)
    # stem conv weights with eval-mode BN scale folded in; stored bf16 for the MXU.
    p['w0a'] = (_kaiming(next(ks), (9, C, C // 2), 9 * C) * BN_FOLD).astype(jnp.bfloat16)
    p['w0b'] = (_kaiming(next(ks), (9, C // 2, C), 9 * (C // 2)) * BN_FOLD).astype(jnp.bfloat16)
    p['w1'] = (_kaiming(next(ks), (9, C, C), 9 * C) * BN_FOLD).astype(jnp.bfloat16)
    p['nodes'] = []
    for i in range(NODES):
        npi = i + 2  # num_possible_inputs for this node
        node = {}
        for br in ('x', 'y'):
            node[br] = {
                'dw': _kaiming(next(ks), (npi, 9, 1, C), 9),                      # f32 (VPU)
                'pw': (_kaiming(next(ks), (npi, C, C), C) * BN_FOLD).astype(jnp.bfloat16),
            }
        p['nodes'].append(node)
    p['w_comb'] = (_kaiming(next(ks), (NODES + 2, C, C), C) * BN_FOLD).astype(jnp.bfloat16)
    p['w_score'] = _kaiming(next(ks), (C, CLASSES), C).astype(jnp.bfloat16)
    p['b_score'] = jnp.zeros((1, CLASSES), jnp.float32)
    return p


# ----------------------------- main ------------------------------------------
if __name__ == "__main__":
    key = jax.random.PRNGKey(0)
    kx, kp = jax.random.split(key)
    # NCHW input like PyTorch: batch=2, 3-channel image, 64x64 spatial.
    x = jax.random.normal(kx, (2, 3, 64, 64), jnp.float32)
    params = init_params(kp)
    arch = [ARCH]  # forward uses arch[0] for the single decoder cell

    out = nao_deeplabv3plus_search_forward(x, (64, 64), arch, params)
    out = jax.block_until_ready(out)
    assert out.shape == (2, CLASSES, 64, 64), out.shape
    assert bool(jnp.all(jnp.isfinite(out)))
    print("KERNEL_OK")
</pallas_src>

<mosaic_0001>
module attributes {stable_mosaic.version = 11 : i64} {
  func.func @_matmul_kernel(%arg0: i32, %arg1: i32, %arg2: i32, %arg3: memref<64x3xbf16, #tpu.memory_space<vmem>>, %arg4: memref<3x256xbf16, #tpu.memory_space<vmem>>, %arg5: memref<1x256xf32, #tpu.memory_space<vmem>>, %arg6: memref<64x256xbf16, #tpu.memory_space<vmem>>, %arg7: memref<64x256xf32, #tpu.memory_space<vmem>>) attributes {dimension_semantics = [#tpu.dimension_semantics<parallel>, #tpu.dimension_semantics<parallel>, #tpu.dimension_semantics<arbitrary>], iteration_bounds = array<i64: 2, 1, 1>, scalar_prefetch = 0 : i64, scratch_operands = 1 : i64, tpu.core_type = #tpu.core_type<tc>, window_params = [{transform_indices = @transform_0, window_bounds = array<i64: 64, 3>}, {transform_indices = @transform_1, window_bounds = array<i64: 3, 256>}, {transform_indices = @transform_2, window_bounds = array<i64: 1, 256>}, {transform_indices = @transform_3, window_bounds = array<i64: 64, 256>}]} {
    %c0_i32 = arith.constant 0 : i32
    %0 = arith.cmpi eq, %arg2, %c0_i32 : i32
    %1 = arith.extui %0 : i1 to i32
    %c0_i32_0 = arith.constant 0 : i32
    %2 = arith.cmpi ne, %1, %c0_i32_0 : i32
    scf.if %2 {
      %cst_10 = arith.constant 0.000000e+00 : f32
      %12 = vector.broadcast %cst_10 : f32 to vector<64x256xf32>
      %c0_11 = arith.constant 0 : index
      %c0_12 = arith.constant 0 : index
      %13 = vector.load %arg7[%c0_11, %c0_12] : memref<64x256xf32, #tpu.memory_space<vmem>>, vector<64x256xf32>
      tpu.vector_store %arg7[%c0_11, %c0_12], %12 {strides = array<i32>} : memref<64x256xf32, #tpu.memory_space<vmem>>, vector<64x256xf32>,
    } else {
    }
    %c0 = arith.constant 0 : index
    %c0_1 = arith.constant 0 : index
    %3 = vector.load %arg3[%c0, %c0_1] : memref<64x3xbf16, #tpu.memory_space<vmem>>, vector<64x3xbf16>
    %c0_2 = arith.constant 0 : index
    %c0_3 = arith.constant 0 : index
    %4 = vector.load %arg7[%c0_2, %c0_3] : memref<64x256xf32, #tpu.memory_space<vmem>>, vector<64x256xf32>
    %c0_4 = arith.constant 0 : index
    %c0_5 = arith.constant 0 : index
    %5 = vector.load %arg4[%c0_4, %c0_5] : memref<3x256xbf16, #tpu.memory_space<vmem>>, vector<3x256xbf16>
    %cst = arith.constant dense<0.000000e+00> : vector<64x256xf32>
    %6 = tpu.matmul %3, %5, %cst {dimension_numbers = #tpu.dot_dimension_numbers<[1], [0], [0], [1], [0, 0, 1, 1], [], []>} : vector<64x3xbf16>, vector<3x256xbf16>, vector<64x256xf32> -> vector<64x256xf32>
    %7 = arith.addf %4, %6 : vector<64x256xf32>
    %c0_6 = arith.constant 0 : index
    %c0_7 = arith.constant 0 : index
    %8 = vector.load %arg7[%c0_6, %c0_7] : memref<64x256xf32, #tpu.memory_space<vmem>>, vector<64x256xf32>
    tpu.vector_store %arg7[%c0_6, %c0_7], %7 {strides = array<i32>} : memref<64x256xf32, #tpu.memory_space<vmem>>, vector<64x256xf32>,
    %c0_i32_8 = arith.constant 0 : i32
    %9 = arith.cmpi eq, %arg2, %c0_i32_8 : i32
    %10 = arith.extui %9 : i1 to i32
    %c0_i32_9 = arith.constant 0 : i32
    %11 = arith.cmpi ne, %10, %c0_i32_9 : i32
    scf.if %11 {
      %c0_10 = arith.constant 0 : index
      %c0_11 = arith.constant 0 : index
      %12 = vector.load %arg7[%c0_10, %c0_11] : memref<64x256xf32, #tpu.memory_space<vmem>>, vector<64x256xf32>
      %c0_12 = arith.constant 0 : index
      %c0_13 = arith.constant 0 : index
      %13 = vector.load %arg5[%c0_12, %c0_13] : memref<1x256xf32, #tpu.memory_space<vmem>>, vector<1x256xf32>
      %14 = vector.broadcast %13 : vector<1x256xf32> to vector<64x256xf32>
      %15 = arith.addf %12, %14 : vector<64x256xf32>
      %cst_14 = arith.constant 0.000000e+00 : f32
      %16 = vector.broadcast %cst_14 : f32 to vector<64x256xf32>
      %17 = arith.maximumf %15, %16 : vector<64x256xf32>
      %18 = arith.truncf %17 : vector<64x256xf32> to vector<64x256xbf16>
      %c0_15 = arith.constant 0 : index
      %c0_16 = arith.constant 0 : index
      %19 = vector.load %arg6[%c0_15, %c0_16] : memref<64x256xbf16, #tpu.memory_space<vmem>>, vector<64x256xbf16>
      tpu.vector_store %arg6[%c0_15, %c0_16], %18 {strides = array<i32>} : memref<64x256xbf16, #tpu.memory_space<vmem>>, vector<64x256xbf16>,
    } else {
    }
    return
  }
  func.func @transform_0(%arg0: i32, %arg1: i32, %arg2: i32) -> (i32, i32) {
    %c0_i32 = arith.constant 0 : i32
    return %arg0, %arg2 : i32, i32
  }
  func.func @transform_1(%arg0: i32, %arg1: i32, %arg2: i32) -> (i32, i32) {
    %c0_i32 = arith.constant 0 : i32
    return %arg2, %arg1 : i32, i32
  }
  func.func @transform_2(%arg0: i32, %arg1: i32, %arg2: i32) -> (i32, i32) {
    %c0_i32 = arith.constant 0 : i32
    %c0_i32_0 = arith.constant 0 : i32
    return %c0_i32, %arg1 : i32, i32
  }
  func.func @transform_3(%arg0: i32, %arg1: i32, %arg2: i32) -> (i32, i32) {
    %c0_i32 = arith.constant 0 : i32
    return %arg0, %arg1 : i32, i32
  }
}

</mosaic_0001>

<bundles_post_ra>
// kernel: tpu_custom_call.1
= control target key start
LH: loop header
LB: loop body
LE: loop exit
PB: predicated region body
PF: predicated region fallthrough
CT: control target
= control target key end

     0   :  { %8 = vsyncpa [#allocation4], 0  ;;  %s1059_s0 = inlined_call_operand.vmem [shape: bf16[128,3], index: 0, kind: input, shape index: {}]   ;;  %s1060_s1 = inlined_call_operand.vmem [shape: bf16[3,256], index: 1, kind: input, shape index: {}]   ;;  %s1061_s2 = inlined_call_operand.vmem [shape: f32[1,256], index: 2, kind: input, shape index: {}]   ;;  %s1062_s3 = inlined_call_operand.hbm [shape: bf16[128,256], index: 3, kind: output, shape index: {}]  }
   0x1   :  { %10 = vsyncpa [#allocation4 + $0x1], 0  ;;  %s924_s12 = smov 0   ;;  %s926_s13 = smov 0  }
   0x2   :  { %s928_s14 = smov 0   ;;  %s930_s15 = smov 0  }
   0x3   :  { %s932_s16 = smov 0   ;;  %s934_s17 = smov 0  }
   0x4 LB: > { %s711_s18 = sadd.s32 4294967295, %s897_s17   ;;  %s712_s19 = sadd.s32 4294967294, %s897_s17   ;;  %s897_s17 = sphi %s934_s17, %s16_s17   ;;  %s893_s16 = sphi %s932_s16, %s1069_s16   ;;  %s889_s15 = sphi %s930_s15, %s1068_s15   ;;  %s885_s14 = sphi %s928_s14, %s1067_s14   ;;  %s881_s13 = sphi %s926_s13, %s1066_s13   ;;  %s877_s12 = sphi %s924_s12, %s1065_s12  }
   0x5   : > { %s35_s20 = sadd.s32 1, %s893_s16  ;;  %s126_s21 = sadd.s32 1, %s885_s14 }
   0x6   : > { %p37_p0 = scmp.ge.s32.totalorder %s35_s20, 2  ;;  %p136_p1 = scmp.ne.s32.totalorder %s885_s14, %s881_s13 }
   0x7   : > { %p137_p2 = scmp.eq.s32.totalorder %s711_s18, 1  ;;  %p142_p3 = scmp.ne.s32.totalorder %s881_s13, %s877_s12 }
   0x8   : > { %s1071_s20 = smov (%p37_p0, %s35_s20), 0  ;;  %p143_p5 = scmp.eq.s32.totalorder %s712_s19, 1 }
   0x9   : > { %p964_p4 = por %p137_p2, %p136_p1  ;;  %s121_s23 = ssub.s32 %s893_s16, %s1071_s20 }
   0xa   : > { %p717_p6 = scmp.ge.s32.totalorder %s897_s17, 1  ;;  %p124_p7 = scmp.eq.s32.totalorder %s121_s23, 0 }
   0xb   : > { %p971_p8 = por %p143_p5, %p142_p3  ;;  %p194_p9 = scmp.lt.s32.totalorder %s897_s17, 3 }
   0xc   : > { %s977_s25 = scalar_select %p124_p7, %s885_s14, %s126_s21  }
   0xd   : > { %p195_p10 = pnand %p717_p6, %p194_p9 }
   0xe   : > { %v725_v0 = vld.sshfl [vmem:[%s1060_s1] sm:$0x33 pattern:$0x76325410] (!%p195_p10)  ;;  %vm348_vm0 = vcmask (!%p195_p10), 1040384   ;;  %vm349_vm1 = vcmask (!%p195_p10), 1041408   ;;  %v484_v12 = vlaneseq (!%p195_p10) }
   0xf   : > { %198 = sbr.rel (%p195_p10) target bundleno = 270 (0x10e), region = 32  ;;  %v334_v1 = vcombine.high (!%p195_p10), %v725_v0, %v725_v0  ;;  %s719_s28 = sshll.u32 (!%p195_p10), %s889_s15, 3  ;;  %v899_v2 = vmov (!%p195_p10), 65535   ;;  %v900_v4 = vmov (!%p195_p10), 0   ;;  %vm335_vm2 = vcmask (!%p195_p10), 23552  }
  0x10   : > { %v350_v3 = vsel (!%p195_p10), %vm348_vm0, 4294967295, %v899_v2  ;;  %390 = vmatprep.mubr.bf16.mxu0 (!%p195_p10), %v900_v4  ;;  %410 = vmatprep.mubr.bf16.mxu1 (!%p195_p10), %v900_v4  ;;  %p235_p11 = scmp.lt.s32.totalorder (!%p195_p10), %s719_s28, 15  ;;  %v485_v13 = vshrl.u32 (!%p195_p10), %v484_v12, 7  ;;  %v482_v15 = vld [vmem:[%s1061_s2] sm:$0x3] (!%p195_p10)  ;;  %s231_s8 = sand.u32 (!%p195_p10), 1, %s881_s13  }
  0x11   : > { %v351_v5 = vsel (!%p195_p10), %vm349_vm1, %v350_v3, 0  ;;  %s718_s9 = sshll.u32 (!%p195_p10), %s231_s8, 6  ;;  %s753_s11 = sshll.u32 (!%p195_p10), %s889_s15, 10 }
  0x12   : > { %v356_v6 = vand.u32 (!%p195_p10), %v351_v5, %v334_v1  ;;  %v353_v7 = vand.u32 (!%p195_p10), %v725_v0, %v351_v5  ;;  %v486_v14 = vsub.s32 (!%p195_p10), 0, %v485_v13  ;;  %v490_v16 = vsub.s32 (!%p195_p10), 1, %v485_v13  ;;  %s992_s10 = scalar_lea.vmem (!%p195_p10), [#allocation3], %s718_s9  ;;  %s1004_s23 = scalar_lea.hbm (!%p195_p10), %s1062_s3, %s753_s11 }
  0x13   : > { %s599_s18 = sshll.u32 (!%p195_p10), %s992_s10, 4  ;;  %s1013_s15 = scalar_lea.sflag (!%p195_p10), [#allocation4], %s231_s8  ;;  %s1006_s18 = int_to_ptr.vmem [resolvable:$true] %s599_s18 }
  0x14   : > { %358 = vmatprep.subr.bf16.mxu0 (!%p195_p10), %v356_v6  ;;  %754 = vmatprep.subr.bf16.mxu1 (!%p195_p10), %v356_v6  ;;  %v487_v17 = vrot.slane (!%p195_p10), %v482_v15, %v486_v14  ;;  %v491_v18 = vrot.slane (!%p195_p10), %v482_v15, %v490_v16  ;;  %s819_s26 = scalar_lea.vmem (!%p195_p10), %s1006_s18, 1024  ;;  %s901_s27 = smov (!%p195_p10), [#allocation3]  }
  0x15   : > { %359 = vmatpush1.bf16.msra.mxu0 (!%p195_p10), %v353_v7  ;;  %755 = vmatpush1.bf16.msra.mxu1 (!%p195_p10), %v353_v7  ;;  %p820_p12 = scmp.ne.s32.totalorder (!%p195_p10), %s1006_s18, %s819_s26 }
  0x16   : > { %s1073_s28 = smov (!%p235_p11, %s719_s28), 15 }
  0x17   : > { %s720_s29 = sshll.u32 %s1073_s28, 2  ;;  %p821_p13 = pnand %p820_p12, %p964_p4 }
  0x18   : > { %s241_s5 = scalar_lea.vmem %s1059_s0, %s720_s29  ;;  %s823_s28 = sshll.u32 %s901_s27, 4  ;;  %s824_s28 = int_to_ptr.vmem [resolvable:$false] %s823_s28 }
  0x19   : > { %v815_v8 = vld [vmem:[%s241_s5] sm:$0xff]   ;;  %v816_v9 = vld [vmem:[%s241_s5 + $0x10] sm:$0xff]   ;;  %v817_v10 = vld [vmem:[%s241_s5 + $0x8] sm:$0xff]   ;;  %p822_p0 = pneg %p821_p13  ;;  %s825_s29 = scalar_lea.vmem %s824_s28, 2048 }
  0x1a   : > { %726 = vmatmul.mubr.msk.bf16.vlgmr.msra.gmra.mrb[0].mxu0 %vm335_vm2, %v815_v8  ;;  %728 = vmatmul.mubr.msk.bf16.vlgmr.msra.gmra.mrb[0].mxu1 %vm335_vm2, %v816_v9  ;;  %v818_v11 = vld [vmem:[%s241_s5 + $0x18] sm:$0xff]   ;;  %p826_p1 = scmp.lt.s32.totalorder %s1006_s18, %s824_s28  ;;  %p827_p2 = scmp.lt.s32.totalorder %s825_s29, %s819_s26 }
  0x1b   : > { %400 = vmatprep.mubr.bf16.mxu0 %v900_v4  ;;  %420 = vmatprep.mubr.bf16.mxu1 %v900_v4 }
  0x1c   : > { %p828_p3 = por %p827_p2, %p826_p1 }
  0x1e   : > { %p829_p5 = pnand %p828_p3, %p822_p0 }
  0x22   : > { %727 = vmatmul.mubr.msk.bf16.gmra.mrb[4].mxu0 %vm335_vm2, %v817_v10  ;;  %729 = vmatmul.mubr.msk.bf16.gmra.mrb[4].mxu1 %vm335_vm2, %v818_v11 }
  0xed   : > { %v392_v19 = vpop.f32.mrb[0].mxu0  ;;  %v412_v21 = vpop.f32.mrb[0].mxu1 }
  0xee   : > { %v494_v20 = vadd.f32 %v487_v17, %v392_v19  ;;  %v394_v22 = vpop.f32.mrb[1].mxu0  ;;  %v502_v23 = vadd.f32 %v487_v17, %v412_v21  ;;  %v414_v25 = vpop.f32.mrb[1].mxu1 }
  0xef   : > { %v495_v24 = vadd.f32 %v491_v18, %v394_v22  ;;  %v396_v26 = vpop.f32.mrb[2].mxu0  ;;  %v503_v28 = vadd.f32 %v491_v18, %v414_v25  ;;  %v416_v30 = vpop.f32.mrb[2].mxu1 }
  0xf0   : > { %v510_v27 = vmax.f32 %v494_v20, 0.0  ;;  %v496_v29 = vadd.f32 %v487_v17, %v396_v26  ;;  %v398_v31 = vpop.f32.mrb[3].mxu0  ;;  %v518_v32 = vmax.f32 %v502_v23, 0.0  ;;  %v504_v34 = vadd.f32 %v487_v17, %v416_v30  ;;  %v418_v36 = vpop.f32.mrb[3].mxu1 }
  0xf1   : > { %v511_v33 = vmax.f32 %v495_v24, 0.0  ;;  %v497_v35 = vadd.f32 %v491_v18, %v398_v31  ;;  %v519_v37 = vmax.f32 %v503_v28, 0.0  ;;  %v505_v39 = vadd.f32 %v491_v18, %v418_v36 }
  0xf2   : > { %v512_v38 = vmax.f32 %v496_v29, 0.0  ;;  %v520_v41 = vmax.f32 %v504_v34, 0.0 }
  0xf3   : > { %v744_v40 = vpack.c.bf16 %v511_v33, %v510_v27  ;;  %v513_v42 = vmax.f32 %v497_v35, 0.0  ;;  %v748_v43 = vpack.c.bf16 %v519_v37, %v518_v32  ;;  %v521_v44 = vmax.f32 %v505_v39, 0.0 }
  0xf5   : > { %574 = vst [vmem:[%s992_s10] sm:$0xff] %v744_v40  ;;  %v745_v45 = vpack.c.bf16 %v513_v42, %v512_v38  ;;  %v402_v46 = vpop.f32.mrb[4].mxu0  ;;  %578 = vst [vmem:[%s992_s10 + $0x20] sm:$0xff] %v748_v43  ;;  %v749_v47 = vpack.c.bf16 %v521_v44, %v520_v41  ;;  %v422_v49 = vpop.f32.mrb[4].mxu1 }
  0xf6   : > { %v498_v48 = vadd.f32 %v487_v17, %v402_v46  ;;  %v404_v50 = vpop.f32.mrb[5].mxu0  ;;  %v506_v51 = vadd.f32 %v487_v17, %v422_v49  ;;  %v424_v53 = vpop.f32.mrb[5].mxu1 }
  0xf7   : > { %575 = vst [vmem:[%s992_s10 + $0x8] sm:$0xff] %v745_v45  ;;  %v499_v52 = vadd.f32 %v491_v18, %v404_v50  ;;  %v406_v54 = vpop.f32.mrb[6].mxu0  ;;  %579 = vst [vmem:[%s992_s10 + $0x28] sm:$0xff] %v749_v47  ;;  %v507_v56 = vadd.f32 %v491_v18, %v424_v53  ;;  %v426_v58 = vpop.f32.mrb[6].mxu1 }
  0xf8   : > { %v514_v55 = vmax.f32 %v498_v48, 0.0  ;;  %v500_v57 = vadd.f32 %v487_v17, %v406_v54  ;;  %v408_v59 = vpop.f32.mrb[7].mxu0  ;;  %v522_v60 = vmax.f32 %v506_v51, 0.0  ;;  %v508_v62 = vadd.f32 %v487_v17, %v426_v58  ;;  %v428_v0 = vpop.f32.mrb[7].mxu1 }
  0xf9   : > { %v515_v61 = vmax.f32 %v499_v52, 0.0  ;;  %v501_v63 = vadd.f32 %v491_v18, %v408_v59  ;;  %v523_v1 = vmax.f32 %v507_v56, 0.0  ;;  %v509_v3 = vadd.f32 %v491_v18, %v428_v0 }
  0xfa   : > { %v516_v2 = vmax.f32 %v500_v57, 0.0  ;;  %v524_v5 = vmax.f32 %v508_v62, 0.0 }
  0xfb   : > { %v746_v4 = vpack.c.bf16 %v515_v61, %v514_v55  ;;  %v517_v6 = vmax.f32 %v501_v63, 0.0  ;;  %v750_v7 = vpack.c.bf16 %v523_v1, %v522_v60  ;;  %v525_v8 = vmax.f32 %v509_v3, 0.0 }
  0xfd   : > { %576 = vst [vmem:[%s992_s10 + $0x10] sm:$0xff] %v746_v4  ;;  %v747_v9 = vpack.c.bf16 %v517_v6, %v516_v2  ;;  %580 = vst [vmem:[%s992_s10 + $0x30] sm:$0xff] %v750_v7  ;;  %v751_v10 = vpack.c.bf16 %v525_v8, %v524_v5 }
  0xff   : > { %577 = vst [vmem:[%s992_s10 + $0x18] sm:$0xff] %v747_v9  ;;  %581 = vst [vmem:[%s992_s10 + $0x38] sm:$0xff] %v751_v10 }
 0x100   : > { %832 = shalt.err (!%p829_p5)
}
 0x101   : > { %s833_s30 = scalar_lea.hbm %s1004_s23, 1024  ;;  %s837_s6 = scalar_lea.hbm %s1062_s3, 2048 }
 0x102   : > { %p834_p6 = scmp.ne.s32.totalorder %s1004_s23, %s833_s30  ;;  %p838_p10 = scmp.lt.u32.totalorder %s1004_s23, %s1062_s3 }
 0x103   : > { %p839_p11 = scmp.lt.u32.totalorder %s837_s6, %s833_s30  ;;  %p841_p13 = scmp.lt.u32.totalorder %s833_s30, %s1004_s23 }
 0x104   : > { %p835_p7 = pnand %p834_p6, %p964_p4 }
 0x105   : > { %p840_p12 = por %p839_p11, %p838_p10 }
 0x106   : > { %p836_p9 = pneg %p835_p7 }
 0x107   : > { %p842_p0 = por %p841_p13, %p840_p12 }
 0x109   : > { %p843_p1 = pnand %p842_p0, %p836_p9 }
 0x10b   : > { %846 = shalt.err (!%p843_p1)
}
 0x10c   : > { %s902_s9 = smov 128   ;;  %s903_s10 = smov 8  }
 0x10d   : > { %756 = dma.vmem_to_hbm [thread:$0]  (%p964_p4), %s1006_s18, 1024, %s1004_s23, %s1013_s15, %s902_s9, %s902_s9, %s903_s10  }
 0x10e PF: > { %p762_p2 = scmp.ge.s32.totalorder %s897_s17, 2  ;;  %s614_s11 = sand.u32 1, %s877_s12  }
 0x10f   : > { %s615_s19 = scalar_lea.sflag [#allocation4], %s614_s11 }
 0x110   : > { %p759_p3 = pnand %p762_p2, %p971_p8 }
 0x112   : > { %872 = dma.done.wait (!%p759_p3), %s615_s19, 1024  }
 0x113   : > { %874 = vsyncadd (!%p759_p3), %s615_s19, 4294966272  ;;  %s16_s17 = sadd.s32 1, %s897_s17   ;;  %s1065_s12 = smov %s881_s13 }
 0x114   : > { %p13_p5 = scmp.ge.s32.totalorder %s16_s17, 4   ;;  %s1066_s13 = smov %s885_s14 }
 0x115   : > { %s1067_s14 = smov %s977_s25  ;;  %s1068_s15 = smov %s893_s16 }
 0x116   : > { %s1069_s16 = smov %s1071_s20  ;;  %15 = sbr.rel (!%p13_p5) target bundleno = 4 (0x4), region = 81 }
 0x11d   :  { %620 = vsyncpa [#allocation4], 1 }
 0x11e   :  { %622 = vsyncpa [#allocation4 + $0x1], 1 }

</bundles_post_ra>
